<compile_context>
chip_gen: v5e
topology: v5e:2x2
jax: 0.10.0
libtpu: 0.0.40
codegen_flags: <defaults>
</compile_context>

<pallas_src>
import functools

import jax
import jax.numpy as jnp
from jax.experimental import pallas as pl
from jax.experimental.pallas import tpu as pltpu


def _round_up(n: int, m: int) -> int:
    return ((n + m - 1) // m) * m


def damped_ode_kernel(x_ref, wt_ref, b_ref, o_ref, acc_ref):
    """One (i, j, k) grid step of  y = x @ W^T - 0.1 * x + b.

    x_ref   : (tm, tf)  x tile, block (i, k) — doubles as the residual tile when k == j
    wt_ref  : (tf, tf)  tile of W^T (in, out layout), block (k, j) — native MXU contraction
    b_ref   : (1,  tf)  bias tile, block (0, j)
    o_ref   : (tm, tf)  output tile, block (i, j)
    acc_ref : (tm, tf)  f32 VMEM accumulator scratch
    """
    j = pl.program_id(1)
    k = pl.program_id(2)

    @pl.when(k == 0)
    def _():
        acc_ref[...] = jnp.zeros_like(acc_ref)

    # Native MXU matmul: W was pre-transposed once in the wrapper, so no
    # per-step relayout/transpose is needed here.
    acc_ref[...] += jnp.dot(x_ref[...], wt_ref[...],
                            preferred_element_type=jnp.float32)

    # Damping residual: when k == j the (i, k) x tile equals the (i, j) output
    # tile, so no separate residual input stream is required.
    @pl.when(k == j)
    def _():
        acc_ref[...] += (-0.1) * x_ref[...].astype(jnp.float32)

    # Epilogue exactly once per output tile: bias add + single lane-dense store.
    @pl.when(k == pl.num_programs(2) - 1)
    def _():
        o_ref[...] = (acc_ref[...] + b_ref[...]).astype(o_ref.dtype)


def prepare_damped_params(weight, bias):
    """One-time parameter prep: pad to lane-dense shapes and transpose W.

    weight : (out_features, in_features)  — PyTorch Linear layout
    bias   : (out_features,)
    Returns (W^T padded to (Fp, Fp), bias padded to (1, Fp)).
    Constant across ODE RHS evaluations, so this is hoisted out of the step.
    """
    F_out, F_in = weight.shape
    if F_out != F_in:
        raise ValueError(
            "DampedODEFunc's -0.1*x residual requires out_features == in_features")
    if bias.shape != (F_out,):
        raise ValueError(f"bias shape {bias.shape} != ({F_out},)")
    Fp = _round_up(F_in, 128)
    wt = jnp.zeros((Fp, Fp), weight.dtype).at[:F_in, :F_out].set(weight.T)
    bp = jnp.zeros((1, Fp), bias.dtype).at[0, :F_out].set(bias)
    return wt, bp


@functools.partial(jax.jit, static_argnames=("tm", "tf"))
def damped_ode_forward(t, x, wt_padded, bias_padded, *, tm=256, tf=512):
    """Mirrors DampedODEFunc.forward(t, x); `t` is accepted but unused.

    `wt_padded`, `bias_padded` come from prepare_damped_params (padded, W^T).
    """
    del t  # time-independent ODE right-hand side

    B, F = x.shape
    Fp = _round_up(F, 128)
    if wt_padded.shape != (Fp, Fp):
        raise ValueError(
            f"wt_padded shape {wt_padded.shape} != ({Fp}, {Fp}); "
            "did you call prepare_damped_params?")
    if bias_padded.shape != (1, Fp):
        raise ValueError(f"bias_padded shape {bias_padded.shape} != (1, {Fp})")

    # Batch (sublane) axis: skinny-batch default tm = Mp so the M grid axis is
    # a single tile and every W tile is streamed from HBM exactly once.
    Mp = _round_up(B, 8)
    tm = min(tm, Mp)
    if Mp % tm != 0:
        Mp = _round_up(Mp, tm)

    # Feature tile (serves as both N and K tile): largest of {512,256,128} that
    # divides Fp (Fp is always a multiple of 128), capped by the request.
    tf_req = max(tf, 128)
    tf = 128
    for cand in (512, 256, 128):
        if cand <= tf_req and Fp % cand == 0:
            tf = cand
            break

    # v7x has 2 TensorCores sharded over "parallel" grid axes: if the M axis
    # has a single tile, keep >= 2 N tiles when possible (no-op on v5e/v6e).
    if Mp // tm == 1:
        while (Fp // tf) < 2 and tf > 128:
            tf //= 2

    # Static fast path: skip padding / final slice for already-aligned shapes.
    needs_pad = (Mp != B) or (Fp != F)
    if needs_pad:
        xp = jnp.zeros((Mp, Fp), x.dtype).at[:B, :F].set(x)
    else:
        xp = x

    grid = (Mp // tm, Fp // tf, Fp // tf)  # (M tiles, N tiles, K reduction)

    out_p = pl.pallas_call(
        damped_ode_kernel,
        out_shape=jax.ShapeDtypeStruct((Mp, Fp), x.dtype),
        grid_spec=pltpu.PrefetchScalarGridSpec(
            num_scalar_prefetch=0,
            grid=grid,
            in_specs=[
                pl.BlockSpec((tm, tf), lambda i, j, k: (i, k)),   # x
                pl.BlockSpec((tf, tf), lambda i, j, k: (k, j)),   # W^T (pre-transposed)
                pl.BlockSpec((1, tf), lambda i, j, k: (0, j)),    # bias
            ],
            out_specs=pl.BlockSpec((tm, tf), lambda i, j, k: (i, j)),
            scratch_shapes=[pltpu.VMEM((tm, tf), jnp.float32)],
        ),
        compiler_params=pltpu.CompilerParams(
            dimension_semantics=("parallel", "parallel", "arbitrary"),
        ),
    )(xp, wt_padded, bias_padded)

    if needs_pad:
        return out_p[:B, :F]
    return out_p


def reference_forward(t, x, weight, bias):
    """Pure-JAX reference (matches torch semantics)."""
    del t
    return -0.1 * x + (x @ weight.T + bias)


if __name__ == "__main__":
    key = jax.random.PRNGKey(0)
    k_x, k_w, k_b = jax.random.split(key, 3)

    batch = 8
    in_features = 32
    out_features = 32   # must equal in_features for the -0.1*x residual
    hidden_size = 32    # unused by forward() (as in the PyTorch module)

    # Deterministic parameter init (PyTorch Linear default: U(-k, k), k=1/sqrt(in))
    kinit = 1.0 / jnp.sqrt(jnp.float32(in_features))
    weight = jax.random.uniform(
        k_w, (out_features, in_features), jnp.float32, minval=-kinit, maxval=kinit)
    bias = jax.random.uniform(
        k_b, (out_features,), jnp.float32, minval=-kinit, maxval=kinit)

    x = jax.random.normal(k_x, (batch, in_features), jnp.float32)
    t = jnp.float32(0.0)  # unused

    # One-time parameter preparation (constant across ODE RHS evaluations).
    wt_p, b_p = prepare_damped_params(weight, bias)

    out = damped_ode_forward(t, x, wt_p, b_p)
    out = jax.block_until_ready(out)

    ref = reference_forward(t, x, weight, bias)
    assert out.shape == (batch, out_features)
    assert jnp.allclose(out, ref, atol=1e-5, rtol=1e-5)

    print("KERNEL_OK")
</pallas_src>

<mosaic_0001>
module attributes {stable_mosaic.version = 11 : i64} {
  func.func @damped_ode_kernel(%arg0: i32, %arg1: i32, %arg2: i32, %arg3: memref<8x128xf32, #tpu.memory_space<vmem>>, %arg4: memref<128x128xf32, #tpu.memory_space<vmem>>, %arg5: memref<1x128xf32, #tpu.memory_space<vmem>>, %arg6: memref<8x128xf32, #tpu.memory_space<vmem>>, %arg7: memref<8x128xf32, #tpu.memory_space<vmem>>) attributes {dimension_semantics = [#tpu.dimension_semantics<parallel>, #tpu.dimension_semantics<parallel>, #tpu.dimension_semantics<arbitrary>], iteration_bounds = array<i64: 1, 1, 1>, scalar_prefetch = 0 : i64, scratch_operands = 1 : i64, tpu.core_type = #tpu.core_type<tc>, window_params = [{transform_indices = @transform_0, window_bounds = array<i64: 8, 128>}, {transform_indices = @transform_1, window_bounds = array<i64: 128, 128>}, {transform_indices = @transform_2, window_bounds = array<i64: 1, 128>}, {transform_indices = @transform_3, window_bounds = array<i64: 8, 128>}]} {
    %c0_i32 = arith.constant 0 : i32
    %0 = arith.cmpi eq, %arg2, %c0_i32 : i32
    %1 = arith.extui %0 : i1 to i32
    %c0_i32_0 = arith.constant 0 : i32
    %2 = arith.cmpi ne, %1, %c0_i32_0 : i32
    scf.if %2 {
      %cst_11 = arith.constant 0.000000e+00 : f32
      %15 = vector.broadcast %cst_11 : f32 to vector<8x128xf32>
      %c0_12 = arith.constant 0 : index
      %c0_13 = arith.constant 0 : index
      %16 = vector.load %arg7[%c0_12, %c0_13] : memref<8x128xf32, #tpu.memory_space<vmem>>, vector<8x128xf32>
      tpu.vector_store %arg7[%c0_12, %c0_13], %15 {strides = array<i32>} : memref<8x128xf32, #tpu.memory_space<vmem>>, vector<8x128xf32>,
    } else {
    }
    %c0 = arith.constant 0 : index
    %c0_1 = arith.constant 0 : index
    %3 = vector.load %arg7[%c0, %c0_1] : memref<8x128xf32, #tpu.memory_space<vmem>>, vector<8x128xf32>
    %c0_2 = arith.constant 0 : index
    %c0_3 = arith.constant 0 : index
    %4 = vector.load %arg3[%c0_2, %c0_3] : memref<8x128xf32, #tpu.memory_space<vmem>>, vector<8x128xf32>
    %c0_4 = arith.constant 0 : index
    %c0_5 = arith.constant 0 : index
    %5 = vector.load %arg4[%c0_4, %c0_5] : memref<128x128xf32, #tpu.memory_space<vmem>>, vector<128x128xf32>
    %cst = arith.constant dense<0.000000e+00> : vector<8x128xf32>
    %6 = tpu.matmul %4, %5, %cst {dimension_numbers = #tpu.dot_dimension_numbers<[1], [0], [0], [1], [0, 0, 1, 1], [], []>} : vector<8x128xf32>, vector<128x128xf32>, vector<8x128xf32> -> vector<8x128xf32>
    %7 = arith.addf %3, %6 : vector<8x128xf32>
    %c0_6 = arith.constant 0 : index
    %c0_7 = arith.constant 0 : index
    %8 = vector.load %arg7[%c0_6, %c0_7] : memref<8x128xf32, #tpu.memory_space<vmem>>, vector<8x128xf32>
    tpu.vector_store %arg7[%c0_6, %c0_7], %7 {strides = array<i32>} : memref<8x128xf32, #tpu.memory_space<vmem>>, vector<8x128xf32>,
    %9 = arith.cmpi eq, %arg2, %arg1 : i32
    %10 = arith.extui %9 : i1 to i32
    %c0_i32_8 = arith.constant 0 : i32
    %11 = arith.cmpi ne, %10, %c0_i32_8 : i32
    scf.if %11 {
      %c0_11 = arith.constant 0 : index
      %c0_12 = arith.constant 0 : index
      %15 = vector.load %arg7[%c0_11, %c0_12] : memref<8x128xf32, #tpu.memory_space<vmem>>, vector<8x128xf32>
      %c0_13 = arith.constant 0 : index
      %c0_14 = arith.constant 0 : index
      %16 = vector.load %arg3[%c0_13, %c0_14] : memref<8x128xf32, #tpu.memory_space<vmem>>, vector<8x128xf32>
      %cst_15 = arith.constant -1.000000e-01 : f32
      %17 = vector.broadcast %cst_15 : f32 to vector<8x128xf32>
      %18 = arith.mulf %17, %16 : vector<8x128xf32>
      %19 = arith.addf %15, %18 : vector<8x128xf32>
      %c0_16 = arith.constant 0 : index
      %c0_17 = arith.constant 0 : index
      %20 = vector.load %arg7[%c0_16, %c0_17] : memref<8x128xf32, #tpu.memory_space<vmem>>, vector<8x128xf32>
      tpu.vector_store %arg7[%c0_16, %c0_17], %19 {strides = array<i32>} : memref<8x128xf32, #tpu.memory_space<vmem>>, vector<8x128xf32>,
    } else {
    }
    %c0_i32_9 = arith.constant 0 : i32
    %12 = arith.cmpi eq, %arg2, %c0_i32_9 : i32
    %13 = arith.extui %12 : i1 to i32
    %c0_i32_10 = arith.constant 0 : i32
    %14 = arith.cmpi ne, %13, %c0_i32_10 : i32
    scf.if %14 {
      %c0_11 = arith.constant 0 : index
      %c0_12 = arith.constant 0 : index
      %15 = vector.load %arg7[%c0_11, %c0_12] : memref<8x128xf32, #tpu.memory_space<vmem>>, vector<8x128xf32>
      %c0_13 = arith.constant 0 : index
      %c0_14 = arith.constant 0 : index
      %16 = vector.load %arg5[%c0_13, %c0_14] : memref<1x128xf32, #tpu.memory_space<vmem>>, vector<1x128xf32>
      %17 = vector.broadcast %16 : vector<1x128xf32> to vector<8x128xf32>
      %18 = arith.addf %15, %17 : vector<8x128xf32>
      %c0_15 = arith.constant 0 : index
      %c0_16 = arith.constant 0 : index
      %19 = vector.load %arg6[%c0_15, %c0_16] : memref<8x128xf32, #tpu.memory_space<vmem>>, vector<8x128xf32>
      tpu.vector_store %arg6[%c0_15, %c0_16], %18 {strides = array<i32>} : memref<8x128xf32, #tpu.memory_space<vmem>>, vector<8x128xf32>,
    } else {
    }
    return
  }
  func.func @transform_0(%arg0: i32, %arg1: i32, %arg2: i32) -> (i32, i32) {
    %c0_i32 = arith.constant 0 : i32
    return %arg0, %arg2 : i32, i32
  }
  func.func @transform_1(%arg0: i32, %arg1: i32, %arg2: i32) -> (i32, i32) {
    %c0_i32 = arith.constant 0 : i32
    return %arg2, %arg1 : i32, i32
  }
  func.func @transform_2(%arg0: i32, %arg1: i32, %arg2: i32) -> (i32, i32) {
    %c0_i32 = arith.constant 0 : i32
    %c0_i32_0 = arith.constant 0 : i32
    return %c0_i32, %arg1 : i32, i32
  }
  func.func @transform_3(%arg0: i32, %arg1: i32, %arg2: i32) -> (i32, i32) {
    %c0_i32 = arith.constant 0 : i32
    return %arg0, %arg1 : i32, i32
  }
}

</mosaic_0001>

<bundles_post_ra>
// kernel: damped_ode_forward.1
= control target key start
LH: loop header
LB: loop body
LE: loop exit
PB: predicated region body
PF: predicated region fallthrough
CT: control target
= control target key end

     0   :  { %8 = vsyncpa [#allocation4], 0  ;;  %s205_s0 = inlined_call_operand.vmem [shape: f32[8,128], index: 0, kind: input, shape index: {}]   ;;  %s206_s1 = inlined_call_operand.hbm [shape: f32[128,128], index: 1, kind: input, shape index: {}]   ;;  %s207_s2 = inlined_call_operand.vmem [shape: f32[1,128], index: 2, kind: input, shape index: {}]   ;;  %s208_s3 = inlined_call_operand.hbm [shape: f32[8,128], index: 3, kind: output, shape index: {}]  }
   0x1   :  { %9 = vsyncpa [#allocation5], 0  ;;  %s16_s14 = sshll.u32 %s206_s1, 4  ;;  %s169_s15 = smov [#allocation3]   ;;  %s17_s14 = int_to_ptr.hbm [resolvable:$true] %s16_s14 }
   0x2   :  { %s18_s16 = sshll.u32 %s169_s15, 4  ;;  %s170_s17 = smov 128   ;;  %s19_s16 = int_to_ptr.vmem [resolvable:$true] %s18_s16 }
   0x3   :  { %s171_s18 = smov 8  }
   0x4   :  { %24 = dma.hbm_to_vmem [thread:$0]  %s17_s14, 2048, %s19_s16, [#allocation4], %s170_s17, %s170_s17, %s171_s18  }
   0x5   :  { %165 = dma.done.wait [#allocation4], 2048  }
   0x6   :  { %166 = vsyncadd [#allocation4], 4294965248  ;;  %v53_v0 = vld [vmem:[#allocation3 + $0x78] sm:$0xff]  ;;  %v52_v1 = vld [vmem:[#allocation3 + $0x70] sm:$0xff]  ;;  %s172_s22 = smov [#allocation6]   ;;  %s102_s26 = sshll.u32 %s208_s3, 4  ;;  %s103_s26 = int_to_ptr.hbm [resolvable:$true] %s102_s26 }
   0x7   :  { %54 = vmatpush.msra.mxu0 %v53_v0  ;;  %v51_v2 = vld [vmem:[#allocation3 + $0x68] sm:$0xff]  ;;  %v50_v3 = vld [vmem:[#allocation3 + $0x60] sm:$0xff]  ;;  %v49_v4 = vld [vmem:[#allocation3 + $0x58] sm:$0xff]  ;;  %s100_s23 = sshll.u32 %s172_s22, 4  ;;  %s101_s23 = int_to_ptr.vmem [resolvable:$true] %s100_s23 }
   0x8   :  { %v48_v5 = vld [vmem:[#allocation3 + $0x50] sm:$0xff]  ;;  %v47_v6 = vld [vmem:[#allocation3 + $0x48] sm:$0xff]  ;;  %v46_v7 = vld [vmem:[#allocation3 + $0x40] sm:$0xff] }
   0x9   :  { %55 = vmatpush.msra.mxu0 %v52_v1  ;;  %v45_v8 = vld [vmem:[#allocation3 + $0x38] sm:$0xff]  ;;  %v44_v9 = vld [vmem:[#allocation3 + $0x30] sm:$0xff]  ;;  %v43_v10 = vld [vmem:[#allocation3 + $0x28] sm:$0xff] }
   0xa   :  { %v42_v11 = vld [vmem:[#allocation3 + $0x20] sm:$0xff]  ;;  %v41_v12 = vld [vmem:[#allocation3 + $0x18] sm:$0xff]  ;;  %v40_v13 = vld [vmem:[#allocation3 + $0x10] sm:$0xff] }
   0xb   :  { %56 = vmatpush.msra.mxu0 %v51_v2  ;;  %v39_v14 = vld [vmem:[#allocation3 + $0x8] sm:$0xff]  ;;  %v38_v15 = vld [vmem:[#allocation3] sm:$0xff] }
   0xc   :  { %v37_v16 = vld [vmem:[%s205_s0] sm:$0xff] }
   0xd   :  { %57 = vmatpush.msra.mxu0 %v50_v3  ;;  %v82_v17 = vmul.f32 -0.1, %v37_v16  ;;  %v116_v18 = vld [vmem:[%s207_s2] ss:$0 sm:$0xff] }
   0xf   :  { %58 = vmatpush.msra.mxu0 %v49_v4 }
  0x11   :  { %59 = vmatpush.msra.mxu0 %v48_v5 }
  0x13   :  { %60 = vmatpush.msra.mxu0 %v47_v6 }
  0x15   :  { %61 = vmatpush.msra.mxu0 %v46_v7 }
  0x17   :  { %62 = vmatpush.msra.mxu0 %v45_v8 }
  0x19   :  { %63 = vmatpush.msra.mxu0 %v44_v9 }
  0x1b   :  { %64 = vmatpush.msra.mxu0 %v43_v10 }
  0x1d   :  { %65 = vmatpush.msra.mxu0 %v42_v11 }
  0x1f   :  { %66 = vmatpush.msra.mxu0 %v41_v12 }
  0x21   :  { %67 = vmatpush.msra.mxu0 %v40_v13 }
  0x23   :  { %68 = vmatpush.msra.mxu0 %v39_v14 }
  0x25   :  { %69 = vmatpush.msra.mxu0 %v38_v15 }
  0x26   :  { %70 = vmatmul.f32.vlgmr.msra.gmra.mxu0 %v37_v16 }
  0xa3   :  { %v71_v19 = vpop.f32.mrf.mxu0 }
  0xa4   :  { %v83_v20 = vadd.f32 %v82_v17, %v71_v19 }
  0xa6   :  { %v93_v21 = vadd.f32 %v116_v18, %v83_v20 }
  0xa8   :  { %94 = vst [vmem:[#allocation6] sm:$0xff] %v93_v21 }
  0xa9   :  { %105 = dma.vmem_to_hbm [thread:$0]  %s101_s23, 128, %s103_s26, [#allocation5]  }
  0xaa   :  { %167 = dma.done.wait [#allocation5], 128  }
  0xab   :  { %168 = vsyncadd [#allocation5], 4294967168 }
  0xac   :  { %110 = vsyncpa [#allocation4], 1 }
  0xad   :  { %111 = vsyncpa [#allocation5], 1 }

</bundles_post_ra>
